<compile_context>
chip_gen: v7x
topology: tpu7x:2x2x1
jax: 0.10.0
libtpu: 0.0.40
codegen_flags: <defaults>
</compile_context>

<pallas_src>
import functools

import numpy as np
import jax
import jax.numpy as jnp
from jax.experimental import pallas as pl
from jax.experimental.pallas import tpu as pltpu


def _sublane_pad(rows, dtype_bytes):
    """Rows padded to the min sublane tile (8 for f32, 16 for bf16, ...)."""
    sub = 8 * max(1, 4 // dtype_bytes)
    return -(-rows // sub) * sub


def _pick_tile(hw, n, c, dtype_bytes, vmem_budget_bytes=4 << 20):
    """Lane-dense (multiple-of-128) spatial tile sized by VMEM budget + grid length."""
    if hw < 256:
        # Too small to split into >=128-lane tiles; single full block
        # (block dim equal to the full array dim is always legal).
        return hw
    c_in = _sublane_pad(c, dtype_bytes)
    c_out = _sublane_pad(c + 1, dtype_bytes)
    # Per-lane VMEM cost of one grid step: input + output blocks, double-buffered.
    bytes_per_lane = dtype_bytes * n * (c_in + c_out) * 2
    t_budget = max(128, (vmem_budget_bytes // bytes_per_lane) // 128 * 128)
    # Guarantee >=2 grid steps (>=4 when the axis is long enough) so the DMA
    # pipeline and v7x's second TensorCore are actually used.
    min_steps = 4 if hw >= 4 * 128 else 2
    t_steps = max(128, (hw // min_steps) // 128 * 128)
    return int(min(t_budget, t_steps))


def mbstd_kernel(x_ref, o_ref, *, C, inv_nm1, inv_c):
    # x_ref: (N, C, T)   o_ref: (N, C+1, T)
    x = x_ref[...]
    xf = x.astype(jnp.float32)

    # Unbiased std over the batch dimension (torch.std default, ddof=1).
    mu = jnp.mean(xf, axis=0, keepdims=True)              # (1, C, T)
    d = xf - mu
    var = jnp.sum(d * d, axis=0) * inv_nm1                # (C, T)
    std = jnp.sqrt(var)

    # Mean over channels -> one stat value per spatial location.
    stat = jnp.sum(std, axis=0, keepdims=True) * inv_c    # (1, T)

    # Passthrough channels + broadcast stat channel, each written once.
    o_ref[:, :C, :] = x
    o_ref[:, C:C + 1, :] = jnp.broadcast_to(
        stat[None], (x.shape[0], 1, x.shape[-1])).astype(o_ref.dtype)


def minibatch_stddev_forward(x):
    """x: (N, C, H, W), any float dtype. Returns (N, C+1, H, W) in the same dtype."""
    N, C, H, W = x.shape
    assert N >= 2, "unbiased std over the batch needs N >= 2"
    HW = H * W
    dtype = x.dtype
    dbytes = jnp.dtype(dtype).itemsize

    T = _pick_tile(HW, N, C, dbytes)
    grid = (pl.cdiv(HW, T),)

    # Scoped-VMEM limit derived from the actual block footprint (double-buffered
    # in + out, sublane padding included); capped at 64 MiB so it is legal on
    # v7x while still unlocking v5e's 16 MiB / v6e's 32 MiB scoped defaults.
    c_in = _sublane_pad(C, dbytes)
    c_out = _sublane_pad(C + 1, dbytes)
    block_bytes = dbytes * T * N * (c_in + c_out) * 2
    vmem_limit = int(min(max(32 << 20, block_bytes + (4 << 20)), 64 << 20))

    cost = pl.CostEstimate(
        flops=3 * N * C * HW,
        transcendentals=C * HW,
        bytes_accessed=(N * C + N * (C + 1)) * HW * dbytes,
    )

    x2 = x.reshape(N, C, HW)

    kernel = functools.partial(
        mbstd_kernel, C=C, inv_nm1=1.0 / float(N - 1), inv_c=1.0 / float(C))

    out = pl.pallas_call(
        kernel,
        out_shape=jax.ShapeDtypeStruct((N, C + 1, HW), dtype),
        grid=grid,
        in_specs=[pl.BlockSpec((N, C, T), lambda i: (0, 0, i))],
        out_specs=pl.BlockSpec((N, C + 1, T), lambda i: (0, 0, i)),
        compiler_params=pltpu.CompilerParams(
            dimension_semantics=("parallel",),
            vmem_limit_bytes=vmem_limit),
        cost_estimate=cost,
    )(x2)

    return out.reshape(N, C + 1, H, W)


def reference_forward(x):
    """Pure-JAX NCHW reference mirroring the PyTorch module."""
    N = x.shape[0]
    stat = jnp.std(x.astype(jnp.float32), axis=0, ddof=1)   # (C, H, W)
    stat = jnp.mean(stat, axis=0)                            # (H, W)
    stat = jnp.broadcast_to(stat[None, None], (N, 1) + stat.shape).astype(x.dtype)
    return jnp.concatenate([x, stat], axis=1)                # (N, C+1, H, W)


if __name__ == "__main__":
    N, C, H, W = 2, 4, 16, 16

    key = jax.random.PRNGKey(0)
    x = jax.random.normal(key, (N, C, H, W), jnp.float32)

    out = jax.block_until_ready(minibatch_stddev_forward(x))
    ref = jax.block_until_ready(reference_forward(x))

    assert out.shape == (N, C + 1, H, W), out.shape
    assert out.dtype == x.dtype, out.dtype
    np.testing.assert_allclose(np.asarray(out), np.asarray(ref),
                               rtol=1e-5, atol=1e-5)
    print("KERNEL_OK")
</pallas_src>

<mosaic_0001>
module attributes {stable_mosaic.version = 11 : i64} {
  func.func @mbstd_kernel(%arg0: i32, %arg1: memref<2x4x128xf32, #tpu.memory_space<vmem>>, %arg2: memref<2x5x128xf32, #tpu.memory_space<vmem>>) attributes {dimension_semantics = [#tpu.dimension_semantics<parallel>], iteration_bounds = array<i64: 2>, scalar_prefetch = 0 : i64, scratch_operands = 0 : i64, tpu.core_type = #tpu.core_type<tc>, window_params = [{transform_indices = @transform_0, window_bounds = array<i64: 2, 4, 128>}, {transform_indices = @transform_1, window_bounds = array<i64: 2, 5, 128>}]} {
    %c0 = arith.constant 0 : index
    %c0_0 = arith.constant 0 : index
    %c0_1 = arith.constant 0 : index
    %0 = vector.load %arg1[%c0, %c0_0, %c0_1] : memref<2x4x128xf32, #tpu.memory_space<vmem>>, vector<2x4x128xf32>
    %cst = arith.constant dense<0.000000e+00> : vector<4x128xf32>
    %1 = vector.multi_reduction <add>, %0, %cst [0] : vector<2x4x128xf32> to vector<4x128xf32>
    %2 = vector.shape_cast %1 : vector<4x128xf32> to vector<1x4x128xf32>
    %cst_2 = arith.constant 2.000000e+00 : f32
    %3 = vector.broadcast %cst_2 : f32 to vector<1x4x128xf32>
    %4 = arith.divf %2, %3 : vector<1x4x128xf32>
    %5 = vector.broadcast %4 : vector<1x4x128xf32> to vector<2x4x128xf32>
    %6 = arith.subf %0, %5 : vector<2x4x128xf32>
    %7 = arith.mulf %6, %6 : vector<2x4x128xf32>
    %cst_3 = arith.constant dense<0.000000e+00> : vector<4x128xf32>
    %8 = vector.multi_reduction <add>, %7, %cst_3 [0] : vector<2x4x128xf32> to vector<4x128xf32>
    %cst_4 = arith.constant 1.000000e+00 : f32
    %9 = vector.broadcast %cst_4 : f32 to vector<4x128xf32>
    %10 = arith.mulf %8, %9 : vector<4x128xf32>
    %11 = math.sqrt %10 : vector<4x128xf32>
    %cst_5 = arith.constant dense<0.000000e+00> : vector<128xf32>
    %12 = vector.multi_reduction <add>, %11, %cst_5 [0] : vector<4x128xf32> to vector<128xf32>
    %13 = vector.shape_cast %12 : vector<128xf32> to vector<1x128xf32>
    %cst_6 = arith.constant 2.500000e-01 : f32
    %14 = vector.broadcast %cst_6 : f32 to vector<1x128xf32>
    %15 = arith.mulf %13, %14 : vector<1x128xf32>
    %c0_7 = arith.constant 0 : index
    %c0_8 = arith.constant 0 : index
    %c0_9 = arith.constant 0 : index
    %16 = vector.load %arg2[%c0_7, %c0_8, %c0_9] : memref<2x5x128xf32, #tpu.memory_space<vmem>>, vector<2x4x128xf32>
    tpu.vector_store %arg2[%c0_7, %c0_8, %c0_9], %0 {strides = array<i32>} : memref<2x5x128xf32, #tpu.memory_space<vmem>>, vector<2x4x128xf32>,
    %17 = vector.shape_cast %15 : vector<1x128xf32> to vector<1x1x128xf32>
    %18 = vector.shape_cast %17 : vector<1x1x128xf32> to vector<1x1x128xf32>
    %19 = vector.broadcast %18 : vector<1x1x128xf32> to vector<2x1x128xf32>
    %c0_10 = arith.constant 0 : index
    %c4 = arith.constant 4 : index
    %c0_11 = arith.constant 0 : index
    %20 = vector.load %arg2[%c0_10, %c4, %c0_11] : memref<2x5x128xf32, #tpu.memory_space<vmem>>, vector<2x1x128xf32>
    tpu.vector_store %arg2[%c0_10, %c4, %c0_11], %19 {strides = array<i32>} : memref<2x5x128xf32, #tpu.memory_space<vmem>>, vector<2x1x128xf32>,
    return
  }
  func.func @transform_0(%arg0: i32) -> (i32, i32, i32) {
    %c0_i32 = arith.constant 0 : i32
    %c0_i32_0 = arith.constant 0 : i32
    %c0_i32_1 = arith.constant 0 : i32
    return %c0_i32, %c0_i32_0, %arg0 : i32, i32, i32
  }
  func.func @transform_1(%arg0: i32) -> (i32, i32, i32) {
    %c0_i32 = arith.constant 0 : i32
    %c0_i32_0 = arith.constant 0 : i32
    %c0_i32_1 = arith.constant 0 : i32
    return %c0_i32, %c0_i32_0, %arg0 : i32, i32, i32
  }
}

</mosaic_0001>

<bundles_post_ra>
// kernel: tpu_custom_call.1
= control target key start
LH: loop header
LB: loop body
LE: loop exit
PB: predicated region body
PF: predicated region fallthrough
CT: control target
= control target key end

     0   :  { %6 = vsyncpa [#allocation3], 0  ;;  %s538_s0 = inlined_call_operand.hbm [shape: f32[2,4,256], index: 0, kind: input, shape index: {}]   ;;  %s539_s1 = inlined_call_operand.vmem [shape: f32[2,5,256], index: 1, kind: output, shape index: {}]  }
   0x1   :  { %8 = vsyncpa [#allocation3 + $0x1], 0  ;;  %s407_s6 = smov 0   ;;  %s409_s7 = smov 0  }
   0x2   :  { %s411_s8 = smov 0   ;;  %s413_s9 = smov 0  }
   0x3 LB: > { %s426_s10 = sadd.s32 4294967295, %s391_s9   ;;  %s429_s11 = sadd.s32 1, %s391_s9   ;;  %s391_s9 = sphi %s413_s9, %s548_s9   ;;  %s387_s8 = sphi %s411_s8, %s547_s8   ;;  %s383_s7 = sphi %s409_s7, %s546_s7   ;;  %s379_s6 = sphi %s407_s6, %s545_s6  }
   0x4   : > { %s18_s12 = ssub.s32 %s391_s9, %s429_s11  ;;  %s21_s13 = sadd.s32 1, %s387_s8 }
   0x5   : > { %p19_p0 = scmp.eq.s32.totalorder %s18_s12, 0  ;;  %p28_p1 = scmp.ne.s32.totalorder %s387_s8, %s383_s7 }
   0x6   : > { %p29_p2 = scmp.eq.s32.totalorder %s391_s9, 0  ;;  %p34_p3 = scmp.ne.s32.totalorder %s383_s7, %s379_s6 }
   0x7   : > { %s439_s14 = scalar_select %p19_p0, %s387_s8, %s21_s13  }
   0x8   : > { %p441_p4 = por %p29_p2, %p28_p1  ;;  %p35_p5 = scmp.eq.s32.totalorder %s426_s10, 0 }
   0x9   : > { %p58_p6 = scmp.eq.s32.totalorder %s426_s10, 1  ;;  %p289_p8 = scmp.lt.s32.totalorder %s391_s9, 2 }
   0xa   : > { %p447_p7 = por %p35_p5, %p34_p3  ;;  %s84_s18 = sand.u32 1, %s387_s8  }
   0xb   : > { %p452_p9 = por %p58_p6, %p28_p1  ;;  %s274_s19 = sshll.u32 %s84_s18, 3 }
   0xc   : > { %s275_s20 = sshll.u32 %s391_s9, 6  ;;  %s88_s24 = scalar_lea.vmem [#allocation2], %s274_s19 }
   0xd   : > { %s542_s17 = scalar_select %p452_p9, 1, 0 }
   0xe   : > { %s461_s23 = scalar_lea.hbm %s538_s0, %s275_s20  ;;  %s94_s25 = sshll.u32 %s88_s24, 4  ;;  %s463_s25 = int_to_ptr.vmem [resolvable:$true] %s94_s25 }
   0xf   : > { %p467_p10 = pnand %p289_p8, %p441_p4  ;;  %s471_s27 = scalar_lea.sflag [#allocation3], %s84_s18 }
  0x10   : > { %s327_s28 = scalar_lea.hbm %s461_s23, 128  ;;  %s332_s2 = scalar_lea.hbm %s538_s0, 256 }
  0x11   : > { %p328_p11 = scmp.ne.s32.totalorder %s461_s23, %s327_s28  ;;  %p329_p12 = pneg %p467_p10 }
  0x12   : > { %p333_p1 = scmp.lt.u32.totalorder %s461_s23, %s538_s0  ;;  %p334_p2 = scmp.lt.u32.totalorder %s332_s2, %s327_s28 }
  0x13   : > { %p330_p13 = pnand %p329_p12, %p328_p11  ;;  %p336_p4 = scmp.lt.u32.totalorder %s327_s28, %s461_s23 }
  0x14   : > { %p335_p3 = por %p334_p2, %p333_p1 }
  0x15   : > { %p331_p0 = pneg %p330_p13 }
  0x16   : > { %p337_p5 = por %p336_p4, %p335_p3 }
  0x18   : > { %p338_p6 = pnand %p337_p5, %p331_p0 }
  0x1a   : > { %341 = shalt.err (!%p338_p6)
}
  0x1b   : > { %s342_s5 = scalar_lea.vmem %s463_s25, 128  ;;  %s393_s6 = smov [#allocation2]  }
  0x1c   : > { %p343_p8 = scmp.ne.s32.totalorder %s463_s25, %s342_s5  ;;  %s347_s12 = sshll.u32 %s393_s6, 4  ;;  %s348_s12 = int_to_ptr.vmem [resolvable:$false] %s347_s12 }
  0x1d   : > { %s349_s13 = scalar_lea.vmem %s348_s12, 256  ;;  %p350_p9 = scmp.lt.s32.totalorder %s463_s25, %s348_s12 }
  0x1e   : > { %p345_p11 = pnand %p343_p8, %p329_p12  ;;  %p351_p1 = scmp.lt.s32.totalorder %s349_s13, %s342_s5 }
  0x20   : > { %p346_p13 = pneg %p345_p11  ;;  %p352_p2 = por %p351_p1, %p350_p9 }
  0x22   : > { %p353_p3 = pnand %p352_p2, %p346_p13 }
  0x24   : > { %356 = shalt.err (!%p353_p3)
}
  0x25   : > { %s394_s15 = smov 128   ;;  %s395_s18 = smov 64  }
  0x26   : > { %s396_s19 = smov 4   ;;  %p276_p12 = scmp.ge.s32.totalorder %s391_s9, 1 }
  0x27   : > { %288 = dma.hbm_to_vmem [thread:$0]  (!%p467_p10), %s461_s23, 128, %s463_s25, %s471_s27, %s394_s15, %s395_s18, %s396_s19  }
  0x28   : > { %p102_p0 = scmp.lt.s32.totalorder %s391_s9, 3 }
  0x2a   : > { %p103_p4 = pnand %p276_p12, %p102_p0 }
  0x2b   : > { %s108_s20 = sand.u32 (!%p103_p4), 1, %s383_s7  }
  0x2c   : > { %106 = sbr.rel (%p103_p4) target bundleno = 105 (0x69), region = 24  ;;  %s277_s21 = sshll.u32 (!%p103_p4), %s108_s20, 3 }
  0x2d   : > { %s109_s22 = scalar_lea.sflag (!%p103_p4), [#allocation3], %s108_s20  ;;  %s112_s24 = scalar_lea.vmem (!%p103_p4), [#allocation2], %s277_s21 }
  0x33   : > { %374 = dma.done.wait (%p447_p7), %s109_s22, 128  }
  0x34   : > { %376 = vsyncadd (%p447_p7), %s109_s22, 4294967168  ;;  %s278_s28 = sshll.u32 %s108_s20, 4  ;;  %vm132_vm0 = vcmask 1043456   ;;  %v130_v0 = vld [vmem:[%s112_s24] sm:$0xf]  ;;  %p544_p7 = scmp.ne.s32.totalorder %s542_s17, 0 }
  0x35   : > { %v131_v1 = vld [vmem:[%s112_s24 + $0x4] sm:$0xf]  ;;  %v133_v2 = vsel %vm132_vm0, %v130_v0, 0.0  ;;  %s507_s9 = scalar_lea.vmem [#allocation4], %s278_s28  ;;  %s280_s16 = sshll.u32 (%p544_p7), %s426_s10, 3 }
  0x36   : > { %160 = vst [vmem:[%s507_s9] sm:$0xf] %v130_v0  ;;  %v134_v3 = vsel %vm132_vm0, %v131_v1, 0.0  ;;  %161 = vst [vmem:[%s507_s9 + $0x8] sm:$0xf] %v131_v1  ;;  %s172_s26 = scalar_lea.vmem (%p544_p7), %s539_s1, %s280_s16 }
  0x37   : > { %v135_v4 = vadd.f32 %v134_v3, %v133_v2 }
  0x39   : > { %v137_v5 = vmul.f32 0.5, %v135_v4 }
  0x3b   : > { %v138_v6 = vsub.f32 %v130_v0, %v137_v5  ;;  %v139_v7 = vsub.f32 %v131_v1, %v137_v5 }
  0x3d   : > { %v140_v8 = vmul.f32 %v138_v6, %v138_v6  ;;  %v141_v9 = vmul.f32 %v139_v7, %v139_v7 }
  0x3f   : > { %v142_v10 = vsel %vm132_vm0, %v140_v8, 0.0  ;;  %v143_v11 = vsel %vm132_vm0, %v141_v9, 0.0 }
  0x40   : > { %v144_v12 = vadd.f32 %v143_v11, %v142_v10 }
  0x42   : > { %325 = vrsqrt.f32 %v144_v12  ;;  %vm147_vm1 = vcmp.eq.f32.partialorder %v144_v12, inf  ;;  %v150_v14 = vand.u32 2147483648, %v144_v12  ;;  %vm149_vm2 = vcmp.eq.f32.partialorder %v144_v12, 0.0 }
  0x4c   : > { %v326_v13 = vpop.eup %325 }
  0x4d   : > { %v146_v15 = vmul.f32 %v326_v13, %v144_v12 }
  0x4f   : > { %v148_v16 = vsel %vm147_vm1, %v144_v12, %v146_v15 }
  0x50   : > { %v151_v17 = vsel %vm149_vm2, %v150_v14, %v148_v16 }
  0x51   : > { %v152_v18 = vsel %vm132_vm0, %v151_v17, 0.0 }
  0x52   : > { %v153_v19 = vrot.slane %v152_v18, 4 }
  0x54   : > { %v154_v20 = vadd.f32 %v153_v19, %v152_v18 }
  0x56   : > { %v155_v21 = vrot.slane %v154_v20, 2 }
  0x58   : > { %v156_v22 = vadd.f32 %v155_v21, %v154_v20 }
  0x5a   : > { %v157_v23 = vrot.slane %v156_v22, 1  ;;  %170 = sbr.rel (!%p544_p7) target bundleno = 105 (0x69), region = 32 }
  0x5c   : > { %v158_v24 = vadd.f32 %v157_v23, %v156_v22 }
  0x5e   : > { %v159_v25 = vmul.f32 0.25, %v158_v24 }
  0x60   : > { %162 = vst [vmem:[%s507_s9 + $0x4] sm:$0x1] %v159_v25  ;;  %163 = vst [vmem:[%s507_s9 + $0xc] sm:$0x1] %v159_v25 }
  0x67   : > { %v202_v26 = vld [vmem:[%s507_s9] sm:$0xff]  ;;  %v204_v27 = vld [vmem:[%s507_s9 + $0x8] sm:$0xff] }
  0x68   : > { %203 = vst [vmem:[%s172_s26] sm:$0xff] %v202_v26  ;;  %205 = vst [vmem:[%s172_s26 + $0x10] sm:$0xff] %v204_v27 }
  0x69 PF: > { %p11_p9 = scmp.ge.s32.totalorder %s429_s11, 4   ;;  %s545_s6 = smov %s383_s7 }
  0x6a   : > { %s546_s7 = smov %s387_s8  ;;  %s547_s8 = smov %s439_s14 }
  0x6b   : > { %s548_s9 = smov %s429_s11  ;;  %13 = sbr.rel (!%p11_p9) target bundleno = 3 (0x3), region = 102 }
  0x72   :  { %221 = vsyncpa [#allocation3], 1 }
  0x73   :  { %223 = vsyncpa [#allocation3 + $0x1], 1 }

</bundles_post_ra>
